<compile_context>
chip_gen: v6e
topology: v6e:2x2x1
jax: 0.10.0
libtpu: 0.0.40
codegen_flags: <defaults>
</compile_context>

<pallas_src>
import functools

import jax
import jax.numpy as jnp
from jax.experimental import pallas as pl
from jax.experimental.pallas import tpu as pltpu


def _round_up(x, m):
    return ((x + m - 1) // m) * m


# ----------------------------- Pallas kernel ------------------------------ #
def _derain_step_kernel(
    t_ref,      # SMEM (1,)      f32 : rectified-flow time t
    pr_ref,     # VMEM (Kp, TM)  bf16: rainy patch tile (tokens on the lane axis)
    pc_ref,     # VMEM (Kp, TM)  bf16: clean patch tile
    wz_ref,     # VMEM (Cz, Kp)  bf16: encoder mean-half weight, transposed
    w1_ref,     # VMEM (Hd, Cz)  bf16: flow-MLP layer-1 weight, transposed
    w1t_ref,    # VMEM (Hd, 1)   f32 : flow-MLP time-conditioning column
    b1p_ref,    # VMEM (Hd, 1)   f32 : flow-MLP layer-1 bias column (encoder bias folded in)
    w2_ref,     # VMEM (Cz, Hd)  bf16: flow-MLP layer-2 weight, transposed
    b2_ref,     # VMEM (Cz, 1)   f32 : flow-MLP layer-2 bias column
    part_ref,   # VMEM (1, 1, 1) f32 : this tile's partial sum of squared errors
    *,
    tm, n_tokens, has_pad,
):
    i = pl.program_id(0)
    t = t_ref[0]

    # --- VAE encode, mean half only (latent_dist.mode()), tokens on lanes ---
    #     (Cz, TM) = W_mean^T (Cz, Kp) @ patches (Kp, TM)      [bf16 operands, f32 accum]
    z_r = jnp.dot(wz_ref[...], pr_ref[...], preferred_element_type=jnp.float32)
    z_c = jnp.dot(wz_ref[...], pc_ref[...], preferred_element_type=jnp.float32)

    # --- rectified flow interpolation + target flow ---
    # Encoder bias cancels in `flow` and is folded into b1p for the MLP input (exact).
    x_t = (1.0 - t) * z_r + t * z_c
    flow = z_c - z_r

    # --- tiny per-pixel, time-conditioned flow MLP (bf16 MXU operands, f32 accumulation) ---
    b1_eff = t * w1t_ref[...] + b1p_ref[...]                         # (Hd, 1), once per tile
    h = jnp.dot(w1_ref[...], x_t.astype(jnp.bfloat16),
                preferred_element_type=jnp.float32) + b1_eff
    h = jnp.maximum(h, 0.0)
    pred = jnp.dot(w2_ref[...], h.astype(jnp.bfloat16),
                   preferred_element_type=jnp.float32) + b2_ref[...]

    # --- per-tile partial sum of squared errors (f32) ---
    err = pred - flow                                                # (Cz, TM) f32
    sq = err * err
    part_ref[...] = jnp.sum(sq).reshape(1, 1, 1)

    if has_pad:
        # Only the last tile can contain zero-padded tokens; redo its sum masked.
        @pl.when(i == pl.num_programs(0) - 1)
        def _mask_last_tile():
            lane = jax.lax.broadcasted_iota(jnp.int32, sq.shape, 1)
            masked = jnp.where(i * tm + lane < n_tokens, sq, 0.0)
            part_ref[...] = jnp.sum(masked).reshape(1, 1, 1)


# --------------------------- fused training loss --------------------------- #
def derain_train_loss(t, rainy_image, clean_image, kparams, *, patch=2, block_tokens=8192):
    """Single fused step: patchify -> VAE-encode(mode) -> rectified-flow MSE loss.

    rainy_image/clean_image: (B, C, H, W) f32 NCHW images.
    kparams: transposed / mean-sliced / bias-folded parameter dict from
             prepare_kernel_params().
    Designed to be wrapped in jax.jit so the patchify transpose, bf16 cast and the
    (at most tm-wide) lane pad fuse into a single HBM pass feeding the kernel.
    """
    # Patchify with tokens on the LAST (lane) axis; stream to the kernel as bf16
    # (MXU operands; the cast fuses with the patchify copy under jit).
    pr = extract_patches_T(rainy_image, patch).astype(jnp.bfloat16)   # (Kp, M)
    pc = extract_patches_T(clean_image, patch).astype(jnp.bfloat16)

    kp, m = pr.shape
    cz = kparams["w2T"].shape[0]

    block_tokens = _round_up(block_tokens, 256)
    tm = min(block_tokens, _round_up(m, 256))       # lane tile, multiple of 256 (MXU wave)
    m_pad = _round_up(m, tm)
    n_tiles = m_pad // tm
    has_pad = m_pad != m

    if has_pad:
        pr = jnp.pad(pr, ((0, 0), (0, m_pad - m)))
        pc = jnp.pad(pc, ((0, 0), (0, m_pad - m)))

    kernel = functools.partial(
        _derain_step_kernel, tm=tm, n_tokens=m, has_pad=has_pad)

    patch_spec = pl.BlockSpec((kp, tm), lambda i: (0, i))             # pipelined token tiles
    full_spec = lambda a: pl.BlockSpec(a.shape, lambda i: (0, 0))     # resident small weights
    smem_spec = pl.BlockSpec(memory_space=pltpu.MemorySpace.SMEM)     # scalar t

    partials = pl.pallas_call(
        kernel,
        out_shape=jax.ShapeDtypeStruct((n_tiles, 1, 1), jnp.float32),
        grid=(n_tiles,),
        in_specs=[
            smem_spec,                      # t
            patch_spec, patch_spec,         # rainy / clean patch tiles
            full_spec(kparams["wzT"]),
            full_spec(kparams["w1T"]), full_spec(kparams["w1tT"]),
            full_spec(kparams["b1pT"]),
            full_spec(kparams["w2T"]), full_spec(kparams["b2T"]),
        ],
        # Independent per-tile partial-sum blocks -> no cross-tile output dependence.
        out_specs=pl.BlockSpec((1, 1, 1), lambda i: (i, 0, 0)),
        compiler_params=pltpu.CompilerParams(
            # Token axis is fully parallel now (per-tile partials), so v7x's 2 TensorCores
            # can both pull HBM and compute.
            dimension_semantics=("parallel",),
            # ~4 MiB/tile at block_tokens=8192; 48 MiB is valid on every generation
            # (v7x: 64 MiB physical) and leaves room for larger block_tokens.
            vmem_limit_bytes=48 * 1024 * 1024,
        ),
    )(
        t, pr, pc,
        kparams["wzT"],
        kparams["w1T"], kparams["w1tT"], kparams["b1pT"],
        kparams["w2T"], kparams["b2T"],
    )

    # Tiny final reduction + mean normalization in plain JAX (global token count).
    return jnp.sum(partials) * (1.0 / float(m * cz))


# ------------------------------ glue (plain JAX) --------------------------- #
def extract_patches_T(img_nchw, p=2):
    """NCHW image -> (C*p*p, B*H/p*W/p) token matrix with tokens on the LAST axis."""
    B, C, H, W = img_nchw.shape
    x = img_nchw.reshape(B, C, H // p, p, W // p, p)
    x = jnp.transpose(x, (1, 3, 5, 0, 2, 4))                        # C, p, p, B, H', W'
    return x.reshape(C * p * p, B * (H // p) * (W // p))


def init_params(key, kp, cz, hidden):
    """PyTorch-layout parameters (encoder conv-as-matmul produces mean || logvar)."""
    ks = jax.random.split(key, 5)
    return {
        "enc_w": 0.1 * jax.random.normal(ks[0], (kp, 2 * cz), jnp.float32),
        "enc_b": 0.01 * jax.random.normal(ks[1], (1, 2 * cz), jnp.float32),
        "w1":    0.1 * jax.random.normal(ks[2], (cz, hidden), jnp.float32),
        "w1t":   0.1 * jax.random.normal(ks[3], (1, hidden), jnp.float32),
        "b1":    jnp.zeros((1, hidden), jnp.float32),
        "w2":    0.1 * jax.random.normal(ks[4], (hidden, cz), jnp.float32),
        "b2":    jnp.zeros((1, cz), jnp.float32),
    }


def prepare_kernel_params(params, cz):
    """Slice the encoder to its mean half (latent_dist.mode()), fold the encoder bias into
    the flow-MLP layer-1 bias (b1' = b1 + bz @ W1, exact), cast MXU operands to bf16, and
    transpose everything to the tokens-on-lane layout used by the kernel.
    The logvar half of the encoder is never computed."""
    wm = params["enc_w"][:, :cz]                                     # (Kp, Cz)
    bm = params["enc_b"][:, :cz]                                     # (1, Cz)
    b1p = params["b1"] + bm @ params["w1"]                           # (1, Hd), f32 fold
    return {
        "wzT":  wm.T.astype(jnp.bfloat16),                           # (Cz, Kp)
        "w1T":  params["w1"].T.astype(jnp.bfloat16),                 # (Hd, Cz)
        "w1tT": params["w1t"].T,                                     # (Hd, 1) f32
        "b1pT": b1p.T,                                               # (Hd, 1) f32
        "w2T":  params["w2"].T.astype(jnp.bfloat16),                 # (Cz, Hd)
        "b2T":  params["b2"].T,                                      # (Cz, 1) f32
    }


def reference_step_f32(t, pr_T, pc_T, params):
    """Pure-f32 JAX reference of the same math (token-major layout)."""
    cz = params["w2"].shape[1]
    pr, pc = pr_T.T, pc_T.T
    wm, bm = params["enc_w"][:, :cz], params["enc_b"][:, :cz]
    x0 = pr @ wm + bm                      # latent_rainy.mode()
    x1 = pc @ wm + bm                      # latent_clean.mode()
    xt = (1.0 - t) * x0 + t * x1
    flow = x1 - x0
    h = jnp.maximum(xt @ params["w1"] + t * params["w1t"] + params["b1"], 0.0)
    pred = h @ params["w2"] + params["b2"]
    return jnp.mean((pred - flow) ** 2)


def reference_step_kernel_precision(t, pr_T, pc_T, kparams):
    """JAX reference mirroring the kernel's precision choices exactly
    (bf16 matmul operands, f32 accumulation/elementwise, folded encoder bias)."""
    f32 = jnp.float32
    bf16 = jnp.bfloat16
    wz = kparams["wzT"].astype(f32)
    z_r = wz @ pr_T.astype(bf16).astype(f32)
    z_c = wz @ pc_T.astype(bf16).astype(f32)
    x_t = (1.0 - t) * z_r + t * z_c
    flow = z_c - z_r
    b1_eff = t * kparams["w1tT"] + kparams["b1pT"]
    h = jnp.maximum(kparams["w1T"].astype(f32) @ x_t.astype(bf16).astype(f32) + b1_eff, 0.0)
    pred = kparams["w2T"].astype(f32) @ h.astype(bf16).astype(f32) + kparams["b2T"]
    return jnp.mean((pred - flow) ** 2)


if __name__ == "__main__":
    key = jax.random.PRNGKey(0)
    k_img, k_par, k_t = jax.random.split(key, 3)

    B, C, H, W = 2, 3, 16, 16      # rainy / clean images (NCHW, as PyTorch)
    P = 2                           # patchify conv stride
    CZ = 4                          # latent channels
    HIDDEN = 32                     # flow-MLP hidden width

    k1, k2 = jax.random.split(k_img)
    rainy_image = jax.random.uniform(k1, (B, C, H, W), jnp.float32)
    clean_image = jax.random.uniform(k2, (B, C, H, W), jnp.float32)

    params = init_params(k_par, kp=C * P * P, cz=CZ, hidden=HIDDEN)
    kparams = prepare_kernel_params(params, CZ)
    t = jax.random.uniform(k_t, (1,), jnp.float32)   # rectified-flow time scalar

    loss_fn = jax.jit(functools.partial(derain_train_loss, patch=P, block_tokens=8192))
    loss = loss_fn(t, rainy_image, clean_image, kparams)
    loss = jax.block_until_ready(loss)

    # Bit-level-close check against a reference that mirrors the kernel's bf16/f32 choices.
    pr_T = extract_patches_T(rainy_image, P)   # (12, 128): features x tokens
    pc_T = extract_patches_T(clean_image, P)
    loss_ref_q = reference_step_kernel_precision(t[0], pr_T, pc_T, kparams)
    assert jnp.allclose(loss, loss_ref_q, rtol=3e-3, atol=1e-6), (loss, loss_ref_q)

    # Looser sanity check against the full-f32 reference (bf16 streaming is a deliberate
    # precision choice for the MXU path).
    loss_ref_f32 = reference_step_f32(t[0], pr_T, pc_T, params)
    assert jnp.allclose(loss, loss_ref_f32, rtol=5e-2, atol=1e-4), (loss, loss_ref_f32)

    print("KERNEL_OK")
</pallas_src>

<mosaic_0001>
module attributes {stable_mosaic.version = 11 : i64} {
  func.func @_derain_step_kernel(%arg0: i32, %arg1: memref<1xf32, #tpu.memory_space<smem>>, %arg2: memref<12x256xbf16, #tpu.memory_space<vmem>>, %arg3: memref<12x256xbf16, #tpu.memory_space<vmem>>, %arg4: memref<4x12xbf16, #tpu.memory_space<vmem>>, %arg5: memref<32x4xbf16, #tpu.memory_space<vmem>>, %arg6: memref<32x1xf32, #tpu.memory_space<vmem>>, %arg7: memref<32x1xf32, #tpu.memory_space<vmem>>, %arg8: memref<4x32xbf16, #tpu.memory_space<vmem>>, %arg9: memref<4x1xf32, #tpu.memory_space<vmem>>, %arg10: memref<1x1x1xf32, #tpu.memory_space<vmem>>) attributes {dimension_semantics = [#tpu.dimension_semantics<parallel>], iteration_bounds = array<i64: 1>, scalar_prefetch = 0 : i64, scratch_operands = 0 : i64, tpu.core_type = #tpu.core_type<tc>, window_params = [{transform_indices = @transform_0, window_bounds = array<i64: 1>}, {transform_indices = @transform_1, window_bounds = array<i64: 12, 256>}, {transform_indices = @transform_2, window_bounds = array<i64: 12, 256>}, {pipeline_mode = #tpu.pipeline_mode<synchronous>, transform_indices = @transform_3, window_bounds = array<i64: 4, 12>}, {pipeline_mode = #tpu.pipeline_mode<synchronous>, transform_indices = @transform_4, window_bounds = array<i64: 32, 4>}, {pipeline_mode = #tpu.pipeline_mode<synchronous>, transform_indices = @transform_5, window_bounds = array<i64: 32, 1>}, {pipeline_mode = #tpu.pipeline_mode<synchronous>, transform_indices = @transform_6, window_bounds = array<i64: 32, 1>}, {pipeline_mode = #tpu.pipeline_mode<synchronous>, transform_indices = @transform_7, window_bounds = array<i64: 4, 32>}, {pipeline_mode = #tpu.pipeline_mode<synchronous>, transform_indices = @transform_8, window_bounds = array<i64: 4, 1>}, {transform_indices = @transform_9, window_bounds = array<i64: 1, 1, 1>}]} {
    %c0 = arith.constant 0 : index
    %0 = memref.load %arg1[%c0] : memref<1xf32, #tpu.memory_space<smem>>
    %c0_0 = arith.constant 0 : index
    %c0_1 = arith.constant 0 : index
    %1 = vector.load %arg4[%c0_0, %c0_1] : memref<4x12xbf16, #tpu.memory_space<vmem>>, vector<4x12xbf16>
    %c0_2 = arith.constant 0 : index
    %c0_3 = arith.constant 0 : index
    %2 = vector.load %arg2[%c0_2, %c0_3] : memref<12x256xbf16, #tpu.memory_space<vmem>>, vector<12x256xbf16>
    %cst = arith.constant dense<0.000000e+00> : vector<4x256xf32>
    %3 = tpu.matmul %1, %2, %cst {dimension_numbers = #tpu.dot_dimension_numbers<[1], [0], [0], [1], [0, 0, 1, 1], [], []>} : vector<4x12xbf16>, vector<12x256xbf16>, vector<4x256xf32> -> vector<4x256xf32>
    %c0_4 = arith.constant 0 : index
    %c0_5 = arith.constant 0 : index
    %4 = vector.load %arg4[%c0_4, %c0_5] : memref<4x12xbf16, #tpu.memory_space<vmem>>, vector<4x12xbf16>
    %c0_6 = arith.constant 0 : index
    %c0_7 = arith.constant 0 : index
    %5 = vector.load %arg3[%c0_6, %c0_7] : memref<12x256xbf16, #tpu.memory_space<vmem>>, vector<12x256xbf16>
    %cst_8 = arith.constant dense<0.000000e+00> : vector<4x256xf32>
    %6 = tpu.matmul %4, %5, %cst_8 {dimension_numbers = #tpu.dot_dimension_numbers<[1], [0], [0], [1], [0, 0, 1, 1], [], []>} : vector<4x12xbf16>, vector<12x256xbf16>, vector<4x256xf32> -> vector<4x256xf32>
    %cst_9 = arith.constant 1.000000e+00 : f32
    %7 = arith.subf %cst_9, %0 : f32
    %8 = vector.broadcast %7 : f32 to vector<4x256xf32>
    %9 = arith.mulf %8, %3 : vector<4x256xf32>
    %10 = vector.broadcast %0 : f32 to vector<4x256xf32>
    %11 = arith.mulf %10, %6 : vector<4x256xf32>
    %12 = arith.addf %9, %11 : vector<4x256xf32>
    %13 = arith.subf %6, %3 : vector<4x256xf32>
    %c0_10 = arith.constant 0 : index
    %c0_11 = arith.constant 0 : index
    %14 = vector.load %arg6[%c0_10, %c0_11] : memref<32x1xf32, #tpu.memory_space<vmem>>, vector<32x1xf32>
    %15 = vector.broadcast %0 : f32 to vector<32x1xf32>
    %16 = arith.mulf %15, %14 : vector<32x1xf32>
    %c0_12 = arith.constant 0 : index
    %c0_13 = arith.constant 0 : index
    %17 = vector.load %arg7[%c0_12, %c0_13] : memref<32x1xf32, #tpu.memory_space<vmem>>, vector<32x1xf32>
    %18 = arith.addf %16, %17 : vector<32x1xf32>
    %c0_14 = arith.constant 0 : index
    %c0_15 = arith.constant 0 : index
    %19 = vector.load %arg5[%c0_14, %c0_15] : memref<32x4xbf16, #tpu.memory_space<vmem>>, vector<32x4xbf16>
    %20 = arith.truncf %12 : vector<4x256xf32> to vector<4x256xbf16>
    %cst_16 = arith.constant dense<0.000000e+00> : vector<32x256xf32>
    %21 = tpu.matmul %19, %20, %cst_16 {dimension_numbers = #tpu.dot_dimension_numbers<[1], [0], [0], [1], [0, 0, 1, 1], [], []>} : vector<32x4xbf16>, vector<4x256xbf16>, vector<32x256xf32> -> vector<32x256xf32>
    %22 = vector.broadcast %18 : vector<32x1xf32> to vector<32x256xf32>
    %23 = arith.addf %21, %22 : vector<32x256xf32>
    %cst_17 = arith.constant 0.000000e+00 : f32
    %24 = vector.broadcast %cst_17 : f32 to vector<32x256xf32>
    %25 = arith.maximumf %23, %24 : vector<32x256xf32>
    %c0_18 = arith.constant 0 : index
    %c0_19 = arith.constant 0 : index
    %26 = vector.load %arg8[%c0_18, %c0_19] : memref<4x32xbf16, #tpu.memory_space<vmem>>, vector<4x32xbf16>
    %27 = arith.truncf %25 : vector<32x256xf32> to vector<32x256xbf16>
    %cst_20 = arith.constant dense<0.000000e+00> : vector<4x256xf32>
    %28 = tpu.matmul %26, %27, %cst_20 {dimension_numbers = #tpu.dot_dimension_numbers<[1], [0], [0], [1], [0, 0, 1, 1], [], []>} : vector<4x32xbf16>, vector<32x256xbf16>, vector<4x256xf32> -> vector<4x256xf32>
    %c0_21 = arith.constant 0 : index
    %c0_22 = arith.constant 0 : index
    %29 = vector.load %arg9[%c0_21, %c0_22] : memref<4x1xf32, #tpu.memory_space<vmem>>, vector<4x1xf32>
    %30 = vector.broadcast %29 : vector<4x1xf32> to vector<4x256xf32>
    %31 = arith.addf %28, %30 : vector<4x256xf32>
    %32 = arith.subf %31, %13 : vector<4x256xf32>
    %33 = arith.mulf %32, %32 : vector<4x256xf32>
    %34 = vector.shape_cast %33 : vector<4x256xf32> to vector<1x4x256xf32>
    %cst_23 = arith.constant dense<0.000000e+00> : vector<1xf32>
    %35 = vector.multi_reduction <add>, %34, %cst_23 [1, 2] : vector<1x4x256xf32> to vector<1xf32>
    %36 = vector.shape_cast %35 : vector<1xf32> to vector<1x1x1xf32>
    %37 = vector.extract %36[0, 0, 0] : f32 from vector<1x1x1xf32>
    %38 = vector.broadcast %37 : f32 to vector<1x1x1xf32>
    %c0_24 = arith.constant 0 : index
    %c0_25 = arith.constant 0 : index
    %c0_26 = arith.constant 0 : index
    %39 = vector.load %arg10[%c0_24, %c0_25, %c0_26] : memref<1x1x1xf32, #tpu.memory_space<vmem>>, vector<1x1x1xf32>
    tpu.vector_store %arg10[%c0_24, %c0_25, %c0_26], %38 {strides = array<i32>} : memref<1x1x1xf32, #tpu.memory_space<vmem>>, vector<1x1x1xf32>,
    %c0_i32 = arith.constant 0 : i32
    %40 = arith.cmpi eq, %arg0, %c0_i32 : i32
    %41 = arith.extui %40 : i1 to i32
    %c0_i32_27 = arith.constant 0 : i32
    %42 = arith.cmpi ne, %41, %c0_i32_27 : i32
    scf.if %42 {
      %43 = tpu.iota {dimensions = array<i32: 1>} : vector<4x256xi32>
      %c256_i32 = arith.constant 256 : i32
      %44 = arith.muli %arg0, %c256_i32 : i32
      %45 = vector.broadcast %44 : i32 to vector<4x256xi32>
      %46 = arith.addi %45, %43 : vector<4x256xi32>
      %c128_i32 = arith.constant 128 : i32
      %47 = vector.broadcast %c128_i32 : i32 to vector<4x256xi32>
      %48 = arith.cmpi slt, %46, %47 : vector<4x256xi32>
      %cst_28 = arith.constant 0.000000e+00 : f32
      %49 = vector.broadcast %cst_28 : f32 to vector<4x256xf32>
      %50 = arith.select %48, %33, %49 : vector<4x256xi1>, vector<4x256xf32>
      %51 = vector.shape_cast %50 : vector<4x256xf32> to vector<1x4x256xf32>
      %cst_29 = arith.constant dense<0.000000e+00> : vector<1xf32>
      %52 = vector.multi_reduction <add>, %51, %cst_29 [1, 2] : vector<1x4x256xf32> to vector<1xf32>
      %53 = vector.shape_cast %52 : vector<1xf32> to vector<1x1x1xf32>
      %54 = vector.extract %53[0, 0, 0] : f32 from vector<1x1x1xf32>
      %55 = vector.broadcast %54 : f32 to vector<1x1x1xf32>
      %c0_30 = arith.constant 0 : index
      %c0_31 = arith.constant 0 : index
      %c0_32 = arith.constant 0 : index
      %56 = vector.load %arg10[%c0_30, %c0_31, %c0_32] : memref<1x1x1xf32, #tpu.memory_space<vmem>>, vector<1x1x1xf32>
      tpu.vector_store %arg10[%c0_30, %c0_31, %c0_32], %55 {strides = array<i32>} : memref<1x1x1xf32, #tpu.memory_space<vmem>>, vector<1x1x1xf32>,
    } else {
    }
    return
  }
  func.func @transform_0(%arg0: i32) -> i32 {
    %c0_i32 = arith.constant 0 : i32
    %c0_i32_0 = arith.constant 0 : i32
    return %c0_i32 : i32
  }
  func.func @transform_1(%arg0: i32) -> (i32, i32) {
    %c0_i32 = arith.constant 0 : i32
    %c0_i32_0 = arith.constant 0 : i32
    return %c0_i32, %arg0 : i32, i32
  }
  func.func @transform_2(%arg0: i32) -> (i32, i32) {
    %c0_i32 = arith.constant 0 : i32
    %c0_i32_0 = arith.constant 0 : i32
    return %c0_i32, %arg0 : i32, i32
  }
  func.func @transform_3(%arg0: i32) -> (i32, i32) {
    %c0_i32 = arith.constant 0 : i32
    %c0_i32_0 = arith.constant 0 : i32
    %c0_i32_1 = arith.constant 0 : i32
    return %c0_i32, %c0_i32_0 : i32, i32
  }
  func.func @transform_4(%arg0: i32) -> (i32, i32) {
    %c0_i32 = arith.constant 0 : i32
    %c0_i32_0 = arith.constant 0 : i32
    %c0_i32_1 = arith.constant 0 : i32
    return %c0_i32, %c0_i32_0 : i32, i32
  }
  func.func @transform_5(%arg0: i32) -> (i32, i32) {
    %c0_i32 = arith.constant 0 : i32
    %c0_i32_0 = arith.constant 0 : i32
    %c0_i32_1 = arith.constant 0 : i32
    return %c0_i32, %c0_i32_0 : i32, i32
  }
  func.func @transform_6(%arg0: i32) -> (i32, i32) {
    %c0_i32 = arith.constant 0 : i32
    %c0_i32_0 = arith.constant 0 : i32
    %c0_i32_1 = arith.constant 0 : i32
    return %c0_i32, %c0_i32_0 : i32, i32
  }
  func.func @transform_7(%arg0: i32) -> (i32, i32) {
    %c0_i32 = arith.constant 0 : i32
    %c0_i32_0 = arith.constant 0 : i32
    %c0_i32_1 = arith.constant 0 : i32
    return %c0_i32, %c0_i32_0 : i32, i32
  }
  func.func @transform_8(%arg0: i32) -> (i32, i32) {
    %c0_i32 = arith.constant 0 : i32
    %c0_i32_0 = arith.constant 0 : i32
    %c0_i32_1 = arith.constant 0 : i32
    return %c0_i32, %c0_i32_0 : i32, i32
  }
  func.func @transform_9(%arg0: i32) -> (i32, i32, i32) {
    %c0_i32 = arith.constant 0 : i32
    %c0_i32_0 = arith.constant 0 : i32
    %c0_i32_1 = arith.constant 0 : i32
    return %arg0, %c0_i32, %c0_i32_0 : i32, i32, i32
  }
}

</mosaic_0001>

<bundles_post_ra>
// kernel: derain_train_loss.1
= control target key start
LH: loop header
LB: loop body
LE: loop exit
PB: predicated region body
PF: predicated region fallthrough
CT: control target
= control target key end

     0   :  { %vm51_vm0 = vcmask 1045504   ;;  %v465_v3 = vmov 0   ;;  %vm47_vm1 = vcmask 97280   ;;  %s606_s0 = inlined_call_operand.<no memory space> [shape: f32[1], index: 0, kind: input, shape index: {}]   ;;  %s607_s1 = inlined_call_operand.vmem [shape: bf16[12,256], index: 1, kind: input, shape index: {}]   ;;  %s608_s2 = inlined_call_operand.vmem [shape: bf16[12,256], index: 2, kind: input, shape index: {}]   ;;  %s609_s3 = inlined_call_operand.vmem [shape: bf16[4,12], index: 3, kind: input, shape index: {}]   ;;  %s610_s4 = inlined_call_operand.vmem [shape: bf16[32,4], index: 4, kind: input, shape index: {}]   ;;  %s611_s5 = inlined_call_operand.vmem [shape: f32[32,1], index: 5, kind: input, shape index: {}]   ;;  %s612_s6 = inlined_call_operand.vmem [shape: f32[32,1], index: 6, kind: input, shape index: {}]   ;;  %s613_s7 = inlined_call_operand.vmem [shape: bf16[4,32], index: 7, kind: input, shape index: {}]   ;;  %s614_s8 = inlined_call_operand.vmem [shape: f32[4,1], index: 8, kind: input, shape index: {}]   ;;  %s615_s9 = inlined_call_operand.hbm [shape: f32[1,1,1], index: 9, kind: output, shape index: {}]  }
   0x1   :  { %v435_v0 = vld [vmem:[%s607_s1 + $0x4] ss:$8 sps:$4 sm:$0x3f]   ;;  %v439_v2 = vld [vmem:[%s607_s1] ss:$8 sps:$4 sm:$0x3f]   ;;  %90 = vmatprep.mubr.bf16.mxu0 %v465_v3  ;;  %147 = vmatprep.mubr.bf16.mxu1 %v465_v3 }
   0x2   :  { %415 = vmatprep.subr.msk.bf16.mxu0 %vm51_vm0, %v435_v0  ;;  %v437_v1 = vld [vmem:[%s608_s2 + $0x4] ss:$8 sps:$4 sm:$0x3f]   ;;  %v440_v4 = vld [vmem:[%s608_s2] ss:$8 sps:$4 sm:$0x3f]   ;;  %434 = vset.pattern.permute.xlu1 %v465_v3 }
   0x3   :  { %v36_v5 = vld [vmem:[%s609_s3] sm:$0x3]  ;;  %419 = vmatprep.subr.msk.bf16.mxu1 %vm51_vm0, %v437_v1  ;;  %v53_v6 = vsel %vm51_vm0, %v439_v2, 0  ;;  %433 = vset.pattern.permute.xlu0 %v465_v3  ;;  %v110_v7 = vsel %vm51_vm0, %v440_v4, 0 }
   0x4   :  { %73 = vmatpush1.bf16.msra.mxu0 %v53_v6  ;;  %130 = vmatpush1.bf16.msra.mxu1 %v110_v7 }
   0x5   :  { %15 = vsyncpa [#allocation4], 0  ;;  %v160_v8 = vstv %s606_s0  ;;  %v167_v9 = vld [vmem:[%s611_s5] sm:$0xff]  ;;  %v168_v11 = vld [vmem:[%s611_s5 + $0x8] sm:$0xff]  ;;  %s156_s16 = ssub.f32 1.0, %s606_s0  ;;  %vm226_vm2 = vcmask 1041408  }
   0x6   :  { %v175_v10 = vld [vmem:[%s612_s6] sm:$0xff]  ;;  %v171_v12 = vmul.f32 %v167_v9, %v160_v8  ;;  %v172_v13 = vmul.f32 %v168_v11, %v160_v8  ;;  %v169_v14 = vld [vmem:[%s611_s5 + $0x10] sm:$0xff]  ;;  %v176_v16 = vld [vmem:[%s612_s6 + $0x8] sm:$0xff]  ;;  %vm219_vm3 = vcmask 31744   ;;  %vm305_vm4 = vcmask 261120  }
   0x7   :  { %416 = vmatmul.mubr.msk.bf16.vlgmr.msra.gmra.mxu0 %vm47_vm1, %v36_v5  ;;  %420 = vmatmul.mubr.msk.bf16.vlgmr.msra.gmra.mxu1 %vm47_vm1, %v36_v5  ;;  %v177_v15 = vld [vmem:[%s612_s6 + $0x10] sm:$0xff]  ;;  %v173_v17 = vmul.f32 %v169_v14, %v160_v8  ;;  %v170_v18 = vld [vmem:[%s611_s5 + $0x18] sm:$0xff]  ;;  %v299_v25 = vld [vmem:[%s614_s8] sm:$0xf]  ;;  %v157_v26 = vstv %s156_s16  ;;  %vm354_vm5 = vcmask 1043456   ;;  %vm368_vm6 = vcmask 0  }
   0x8   :  { %265 = vmatprep.mubr.bf16.mxu0 %v465_v3  ;;  %341 = vmatprep.mubr.bf16.mxu1 %v465_v3  ;;  %v179_v19 = vadd.f32 %v175_v10, %v171_v12  ;;  %v174_v20 = vmul.f32 %v170_v18, %v160_v8  ;;  %v178_v21 = vld [vmem:[%s612_s6 + $0x18] sm:$0xff]  ;;  %v180_v23 = vadd.f32 %v176_v16, %v172_v13  ;;  %v441_v46 = vld [vmem:[%s610_s4] sm:$0xff]   ;;  %v442_v47 = vld [vmem:[%s610_s4 + $0x8] sm:$0xff]  }
   0x9   :  { %v181_v22 = vadd.f32 %v177_v15, %v173_v17  ;;  %v294_v16 = vld [vmem:[%s613_s7] sm:$0x3]  ;;  %s466_s7 = smov [#allocation3]  }
   0xa   :  { %191 = vperm.xlu1 %434, %v179_v19   ;;  %v182_v24 = vadd.f32 %v178_v21, %v174_v20  ;;  %s405_s1 = sshll.u32 %s466_s7, 4  ;;  %s406_s1 = int_to_ptr.vmem [resolvable:$true] %s405_s1 }
   0xb   :  { %201 = vperm.xlu0 %433, %v181_v22   ;;  %s443_s19 = scalar_lea.vmem %s406_s1, 16  ;;  %s447_s20 = scalar_lea.vmem %s406_s1, 32 }
   0xc   :  { %p444_p0 = scmp.ne.s32.totalorder %s406_s1, %s443_s19  ;;  %p448_p1 = scmp.lt.s32.totalorder %s406_s1, %s406_s1 }
   0xd   :  { %p449_p2 = scmp.lt.s32.totalorder %s447_s20, %s443_s19 }
   0xe   :  { %196 = vperm.xlu1 %434, %v180_v23  }
   0xf   :  { %206 = vperm.xlu0 %433, %v182_v24   ;;  %p450_p3 = por %p449_p2, %p448_p1 }
  0x11   :  { %p451_p4 = pnand %p450_p3, %p444_p0 }
  0x13   :  { %302 = vperm.xlu0 %433, %v299_v25  }
  0x85   :  { %v192_v51 = vpop.permute.xlu1 %191 }
  0x86   :  { %v202_v52 = vpop.permute.xlu0 %201 }
  0x89   :  { %v197_v56 = vpop.permute.xlu1 %196 }
  0x8a   :  { %v207_v57 = vpop.permute.xlu0 %206 }
  0x8e   :  { %v303_v17 = vpop.permute.xlu0 %302 }
  0xc7   :  { %v571_v27 = vpop.f32.mrf.mxu0  ;;  %v574_v29 = vpop.f32.mrf.mxu1 }
  0xc8   :  { %v158_v28 = vmul.f32 %v157_v26, %v571_v27  ;;  %v161_v30 = vmul.f32 %v160_v8, %v574_v29  ;;  %v165_v31 = vsub.f32 %v574_v29, %v571_v27 }
  0xc9   :  { %v579_v32 = vpop.f32.mrf.mxu0  ;;  %v582_v34 = vpop.f32.mrf.mxu1 }
  0xca   :  { %v159_v33 = vmul.f32 %v157_v26, %v579_v32  ;;  %v163_v35 = vadd.f32 %v161_v30, %v158_v28  ;;  %v162_v36 = vmul.f32 %v160_v8, %v582_v34  ;;  %v166_v37 = vsub.f32 %v582_v34, %v579_v32 }
  0xcb   :  { %v96_v38 = vpop.f32.mrf.mxu0  ;;  %v153_v39 = vpop.f32.mrf.mxu1 }
  0xcc   :  { %v187_v40 = vpack.c.bf16 %v163_v35, %v163_v35  ;;  %v164_v41 = vadd.f32 %v162_v36, %v159_v33 }
  0xcd   :  { %v97_v42 = vpop.f32.mrf.mxu0  ;;  %v154_v43 = vpop.f32.mrf.mxu1 }
  0xce   :  { %v188_v44 = vpack.c.bf16 %v164_v41, %v164_v41  ;;  %v228_v45 = vsel %vm226_vm2, %v187_v40, 0 }
  0xd0   :  { %423 = vmatprep.subr.msk.bf16.mxu0 %vm226_vm2, %v188_v44 }
  0xd1   :  { %248 = vmatpush1.bf16.msra.mxu0 %v228_v45 }
  0xd4   :  { %424 = vmatmul.mubr.msk.bf16.vlgmr.msra.gmra.mxu0 %vm219_vm3, %v441_v46 }
  0xd5   :  { %275 = vmatprep.mubr.bf16.mxu0 %v465_v3 }
  0xdc   :  { %425 = vmatmul.mubr.msk.bf16.gmra.mxu0 %vm219_vm3, %v442_v47 }
 0x194   :  { %v267_v48 = vpop.f32.mrf.mxu0 }
 0x195   :  { %v268_v7 = vadd.f32 %v267_v48, %v192_v51 }
 0x196   :  { %v269_v49 = vpop.f32.mrf.mxu0 }
 0x197   :  { %v270_v0 = vadd.f32 %v269_v49, %v192_v51  ;;  %v286_v14 = vmax.f32 %v268_v7, 0.0 }
 0x198   :  { %v271_v50 = vpop.f32.mrf.mxu0 }
 0x199   :  { %v272_v2 = vadd.f32 %v271_v50, %v197_v56  ;;  %v287_v9 = vmax.f32 %v270_v0, 0.0 }
 0x19a   :  { %v273_v53 = vpop.f32.mrf.mxu0 }
 0x19b   :  { %v274_v59 = vadd.f32 %v273_v53, %v197_v56  ;;  %v288_v11 = vmax.f32 %v272_v2, 0.0 }
 0x19c   :  { %v277_v54 = vpop.f32.mrf.mxu0 }
 0x19d   :  { %v278_v62 = vadd.f32 %v277_v54, %v202_v52  ;;  %v289_v4 = vmax.f32 %v274_v59, 0.0  ;;  %v295_v15 = vpack.c.bf16 %v288_v11, %v286_v14 }
 0x19e   :  { %v279_v55 = vpop.f32.mrf.mxu0 }
 0x19f   :  { %v280_v60 = vadd.f32 %v279_v55, %v202_v52  ;;  %v290_v8 = vmax.f32 %v278_v62, 0.0  ;;  %v296_v13 = vpack.c.bf16 %v289_v4, %v287_v9 }
 0x1a0   :  { %v281_v58 = vpop.f32.mrf.mxu0 }
 0x1a1   :  { %v282_v61 = vadd.f32 %v281_v58, %v207_v57  ;;  %v291_v5 = vmax.f32 %v280_v60, 0.0 }
 0x1a2   :  { %v283_v63 = vpop.f32.mrf.mxu0 }
 0x1a3   :  { %v284_v1 = vadd.f32 %v283_v63, %v207_v57  ;;  %v292_v3 = vmax.f32 %v282_v61, 0.0 }
 0x1a5   :  { %v293_v6 = vmax.f32 %v284_v1, 0.0  ;;  %v297_v12 = vpack.c.bf16 %v292_v3, %v290_v8 }
 0x1a7   :  { %v298_v10 = vpack.c.bf16 %v293_v6, %v291_v5 }
 0x1a9   :  { %321 = vmatprep.subr.bf16.mxu1 %v298_v10 }
 0x1aa   :  { %322 = vmatpush1.bf16.msra.mxu1 %v297_v12 }
 0x1ab   :  { %323 = vmatprep.subr.bf16.mxu1 %v296_v13 }
 0x1ae   :  { %324 = vmatpush1.bf16.msra.mxu1 %v295_v15 }
 0x1b1   :  { %426 = vmatmul.mubr.msk.bf16.vlgmr.msra.gmra.mxu1 %vm305_vm4, %v294_v16 }
 0x271   :  { %v343_v18 = vpop.f32.mrf.mxu1 }
 0x272   :  { %v344_v19 = vadd.f32 %v343_v18, %v303_v17 }
 0x273   :  { %v345_v20 = vpop.f32.mrf.mxu1 }
 0x274   :  { %v350_v21 = vsub.f32 %v344_v19, %v165_v31  ;;  %v346_v22 = vadd.f32 %v345_v20, %v303_v17 }
 0x275   :  { %v347_v23 = vpop.f32.mrf.mxu1 }
 0x276   :  { %v351_v24 = vsub.f32 %v346_v22, %v166_v37  ;;  %v352_v25 = vmul.f32 %v350_v21, %v350_v21 }
 0x277   :  { %v348_v26 = vpop.f32.mrf.mxu1 }
 0x278   :  { %v353_v28 = vmul.f32 %v351_v24, %v351_v24  ;;  %v355_v30 = vsel %vm354_vm5, %v352_v25, 0.0 }
 0x279   :  { %388 = vadd.xlane.f32.xlu0 %v355_v30 }
 0x27a   :  { %v356_v33 = vsel %vm354_vm5, %v353_v28, 0.0 }
 0x27b   :  { %v357_v35 = vadd.f32 %v356_v33, %v355_v30 }
 0x27d   :  { %358 = vadd.xlane.f32.xlu1 %v357_v35 }
 0x302   :  { %v389_v36 = vpop.xlane.xlu0 %388 }
 0x303   :  { %v390_v38 = vrot.slane %v389_v36, 4 }
 0x305   :  { %v391_v39 = vadd.f32 %v390_v38, %v389_v36 }
 0x306   :  { %v359_v27 = vpop.xlane.xlu1 %358 }
 0x307   :  { %v392_v29 = vrot.slane %v391_v39, 2  ;;  %v360_v31 = vrot.slane %v359_v27, 4 }
 0x309   :  { %v361_v40 = vadd.f32 %v360_v31, %v359_v27  ;;  %v393_v41 = vadd.f32 %v392_v29, %v391_v39 }
 0x30b   :  { %v362_v42 = vrot.slane %v361_v40, 2  ;;  %v394_v32 = vrot.slane %v393_v41, 1 }
 0x30d   :  { %v363_v43 = vadd.f32 %v362_v42, %v361_v40  ;;  %v395_v44 = vadd.f32 %v394_v32, %v393_v41 }
 0x30f   :  { %v364_v34 = vrot.slane %v363_v43, 1 }
 0x311   :  { %v365_v37 = vadd.f32 %v364_v34, %v363_v43 }
 0x313   :  { %427 = vpush %v365_v37 }
 0x314   :  { %429 = vpush %v395_v44 }
 0x344   :  { %s428_s2 = spop %427 }
 0x345   :  { %v367_v45 = vstv %s428_s2  ;;  %s430_s3 = spop %429 }
 0x346   :  { %369 = vst.msk [vmem:[#allocation3] sm:$0x1] %vm368_vm6, %v367_v45  ;;  %v397_v46 = vstv %s430_s3 }
 0x347   :  { %398 = vst.msk [vmem:[#allocation3] sm:$0x1] %vm368_vm6, %v397_v46 }
 0x348   :  { %454 = shalt.err (!%p451_p4)
}
 0x349   :  { %408 = dma.vmem_to_hbm [thread:$0]  %s406_s1, 16, %s615_s9, [#allocation4]  }
 0x34a   :  { %463 = dma.done.wait [#allocation4], 16  }
 0x34b   :  { %464 = vsyncadd [#allocation4], 4294967280 }
 0x34c   :  { %412 = vsyncpa [#allocation4], 1 }

</bundles_post_ra>
